<compile_context>
chip_gen: v7x
topology: tpu7x:2x2x1
jax: 0.10.0
libtpu: 0.0.40
codegen_flags: <defaults>
</compile_context>

<pallas_src>
from functools import partial

import jax
import jax.numpy as jnp
import numpy as np
from jax.experimental import pallas as pl
from jax.experimental.pallas import tpu as pltpu


def _round_up(x, m):
    return ((x + m - 1) // m) * m


def hw_kernel(x_ref, neis_ref, h_ref, dg_ref,
              wxi_ref, bxi_ref, wrou_ref, brou_ref,
              rep_ref, grp_ref, out_ref, *, s, mu):
    # Per-tile shapes:
    #   x_ref    : (tn, 2*ln+10)   node inputs to Xi
    #   neis_ref : (tn, ln)        neighbor embeddings (input to Rou)
    #   h_ref    : (tn, s)         hidden state H
    #   dg_ref   : (tn, 1)         per-node degree
    #   wxi_ref  : (2*ln+10, s*s)  Xi.linear weight (in, out) layout
    #   bxi_ref  : (1, s*s)        Xi.linear bias
    #   wrou_ref : (ln, s)         Rou.linear weight
    #   brou_ref : (1, s)          Rou.linear bias
    #   rep_ref  : (s, s*s)        constant replicate matrix
    #   grp_ref  : (s*s, s)        constant group-sum matrix
    #   out_ref  : (tn, s)

    # --- Xi: tanh(X @ Wxi + bxi), scaled by mu / s / dg  ->  A_flat [tn, s*s]
    xi = jnp.tanh(
        jnp.dot(x_ref[...], wxi_ref[...], preferred_element_type=jnp.float32)
        + bxi_ref[...])
    scale = (mu / s) / dg_ref[...]                    # (tn, 1): per-row divide
    a_flat = xi * scale                               # broadcast multiply

    # --- Rou: tanh(neis @ Wrou + brou)  ->  b [tn, s]
    b = jnp.tanh(
        jnp.dot(neis_ref[...], wrou_ref[...], preferred_element_type=jnp.float32)
        + brou_ref[...])

    # --- Batched mat-vec via MXU:
    #   h_rep[n, i*s+j] = H[n, j];  out[n, i] = sum_j A_flat[n, i*s+j]*H[n, j]
    h_rep = jnp.dot(h_ref[...], rep_ref[...],
                    preferred_element_type=jnp.float32)      # [tn, s*s]
    out = jnp.dot(a_flat * h_rep, grp_ref[...],
                  preferred_element_type=jnp.float32) + b    # [tn, s]
    out_ref[...] = out.astype(out_ref.dtype)


def hw_forward(X, neis_embeds, H, dg_list, params, *, s, mu=0.9, tile_n=256):
    """Hw.forward.  X:[N,2*ln+10], neis_embeds:[N,ln], H:[N,s], dg_list:[N]."""
    wxi, bxi, wrou, brou = params
    N, d_xi = X.shape
    ln = neis_embeds.shape[1]
    s2 = s * s

    X = jnp.asarray(X, jnp.float32)
    neis = jnp.asarray(neis_embeds, jnp.float32)     # torch does .float()
    H = jnp.asarray(H, jnp.float32)
    dg = jnp.asarray(dg_list, jnp.float32).reshape(-1)

    # Tile size: multiple of 8, no larger than the (8-aligned) node count.
    n8 = _round_up(max(N, 8), 8)
    tn = min(_round_up(tile_n, 8), n8)
    Np = _round_up(N, tn)

    # Ragged tail: pad node axis; padded rows use dg=1 (no div-by-zero) and
    # are sliced off at the end.
    n_pad = Np - N
    if n_pad:
        X = jnp.pad(X, ((0, n_pad), (0, 0)))
        neis = jnp.pad(neis, ((0, n_pad), (0, 0)))
        H = jnp.pad(H, ((0, n_pad), (0, 0)))
        dg = jnp.pad(dg, (0, n_pad), constant_values=1.0)

    dg2 = dg.reshape(Np, 1)
    wxi = jnp.asarray(wxi, jnp.float32)
    bxi2 = jnp.asarray(bxi, jnp.float32).reshape(1, s2)
    wrou = jnp.asarray(wrou, jnp.float32)
    brou2 = jnp.asarray(brou, jnp.float32).reshape(1, s)

    # Constant replicate / group-sum matrices (host-built, resident in VMEM).
    k = np.arange(s2)
    rep = (k[None, :] % s == np.arange(s)[:, None]).astype(np.float32)   # [s, s*s]
    grp = (k[:, None] // s == np.arange(s)[None, :]).astype(np.float32)  # [s*s, s]
    rep = jnp.asarray(rep)
    grp = jnp.asarray(grp)

    out = pl.pallas_call(
        partial(hw_kernel, s=s, mu=mu),
        out_shape=jax.ShapeDtypeStruct((Np, s), jnp.float32),
        grid_spec=pltpu.PrefetchScalarGridSpec(
            num_scalar_prefetch=0,
            grid=(Np // tn,),
            in_specs=[
                pl.BlockSpec((tn, d_xi), lambda i: (i, 0)),   # X tile
                pl.BlockSpec((tn, ln), lambda i: (i, 0)),     # neis tile
                pl.BlockSpec((tn, s), lambda i: (i, 0)),      # H tile
                pl.BlockSpec((tn, 1), lambda i: (i, 0)),      # dg tile
                pl.BlockSpec((d_xi, s2), lambda i: (0, 0)),   # Wxi (resident)
                pl.BlockSpec((1, s2), lambda i: (0, 0)),      # bxi
                pl.BlockSpec((ln, s), lambda i: (0, 0)),      # Wrou
                pl.BlockSpec((1, s), lambda i: (0, 0)),       # brou
                pl.BlockSpec((s, s2), lambda i: (0, 0)),      # REP (resident)
                pl.BlockSpec((s2, s), lambda i: (0, 0)),      # GRP (resident)
            ],
            out_specs=pl.BlockSpec((tn, s), lambda i: (i, 0)),
        ),
        compiler_params=pltpu.CompilerParams(
            dimension_semantics=("parallel",)),
    )(X, neis, H, dg2, wxi, bxi2, wrou, brou2, rep, grp)

    return out[:N]


if __name__ == "__main__":
    key = jax.random.PRNGKey(0)
    ks = jax.random.split(key, 8)

    # Small shapes consistent with the module: ln hidden, s state size,
    # Xi input width 2*ln+10, N nodes.  le is unused in forward.
    ln, le, s, mu = 16, 5, 8, 0.9
    N = 16
    d_xi = 2 * ln + 10          # 42
    s2 = s * s

    X = jax.random.normal(ks[0], (N, d_xi), dtype=jnp.float32)
    neis_embeds = jax.random.normal(ks[1], (N, ln), dtype=jnp.float32)
    H = jax.random.normal(ks[2], (N, s), dtype=jnp.float32)
    dg_list = jax.random.randint(ks[3], (N,), 1, 6).astype(jnp.float32)

    # Deterministic parameters for Xi.linear and Rou.linear (bias=True).
    wxi = 0.1 * jax.random.normal(ks[4], (d_xi, s2), dtype=jnp.float32)
    bxi = 0.1 * jax.random.normal(ks[5], (s2,), dtype=jnp.float32)
    wrou = 0.1 * jax.random.normal(ks[6], (ln, s), dtype=jnp.float32)
    brou = 0.1 * jax.random.normal(ks[7], (s,), dtype=jnp.float32)

    out = hw_forward(X, neis_embeds, H, dg_list, (wxi, bxi, wrou, brou),
                     s=s, mu=mu)
    jax.block_until_ready(out)

    # Pure-JAX reference of the exact torch semantics.
    A = jnp.tanh(X @ wxi + bxi) * mu / s / dg_list[:, None]
    A = A.reshape(N, s, s)
    b = jnp.tanh(neis_embeds @ wrou + brou)
    ref = jnp.einsum('nij,nj->ni', A, H) + b

    np.testing.assert_allclose(np.asarray(out), np.asarray(ref),
                               rtol=1e-4, atol=1e-4)
    print("KERNEL_OK")
</pallas_src>

<mosaic_0001>
module attributes {stable_mosaic.version = 11 : i64} {
  func.func @hw_kernel(%arg0: i32, %arg1: memref<16x42xf32, #tpu.memory_space<vmem>>, %arg2: memref<16x16xf32, #tpu.memory_space<vmem>>, %arg3: memref<16x8xf32, #tpu.memory_space<vmem>>, %arg4: memref<16x1xf32, #tpu.memory_space<vmem>>, %arg5: memref<42x64xf32, #tpu.memory_space<vmem>>, %arg6: memref<1x64xf32, #tpu.memory_space<vmem>>, %arg7: memref<16x8xf32, #tpu.memory_space<vmem>>, %arg8: memref<1x8xf32, #tpu.memory_space<vmem>>, %arg9: memref<8x64xf32, #tpu.memory_space<vmem>>, %arg10: memref<64x8xf32, #tpu.memory_space<vmem>>, %arg11: memref<16x8xf32, #tpu.memory_space<vmem>>) attributes {dimension_semantics = [#tpu.dimension_semantics<parallel>], iteration_bounds = array<i64: 1>, scalar_prefetch = 0 : i64, scratch_operands = 0 : i64, tpu.core_type = #tpu.core_type<tc>, window_params = [{transform_indices = @transform_0, window_bounds = array<i64: 16, 42>}, {transform_indices = @transform_1, window_bounds = array<i64: 16, 16>}, {transform_indices = @transform_2, window_bounds = array<i64: 16, 8>}, {transform_indices = @transform_3, window_bounds = array<i64: 16, 1>}, {pipeline_mode = #tpu.pipeline_mode<synchronous>, transform_indices = @transform_4, window_bounds = array<i64: 42, 64>}, {pipeline_mode = #tpu.pipeline_mode<synchronous>, transform_indices = @transform_5, window_bounds = array<i64: 1, 64>}, {pipeline_mode = #tpu.pipeline_mode<synchronous>, transform_indices = @transform_6, window_bounds = array<i64: 16, 8>}, {pipeline_mode = #tpu.pipeline_mode<synchronous>, transform_indices = @transform_7, window_bounds = array<i64: 1, 8>}, {pipeline_mode = #tpu.pipeline_mode<synchronous>, transform_indices = @transform_8, window_bounds = array<i64: 8, 64>}, {pipeline_mode = #tpu.pipeline_mode<synchronous>, transform_indices = @transform_9, window_bounds = array<i64: 64, 8>}, {transform_indices = @transform_10, window_bounds = array<i64: 16, 8>}]} {
    %c0 = arith.constant 0 : index
    %c0_0 = arith.constant 0 : index
    %0 = vector.load %arg1[%c0, %c0_0] : memref<16x42xf32, #tpu.memory_space<vmem>>, vector<16x42xf32>
    %c0_1 = arith.constant 0 : index
    %c0_2 = arith.constant 0 : index
    %1 = vector.load %arg5[%c0_1, %c0_2] : memref<42x64xf32, #tpu.memory_space<vmem>>, vector<42x64xf32>
    %cst = arith.constant dense<0.000000e+00> : vector<16x64xf32>
    %2 = tpu.matmul %0, %1, %cst {dimension_numbers = #tpu.dot_dimension_numbers<[1], [0], [0], [1], [0, 0, 1, 1], [], []>} : vector<16x42xf32>, vector<42x64xf32>, vector<16x64xf32> -> vector<16x64xf32>
    %c0_3 = arith.constant 0 : index
    %c0_4 = arith.constant 0 : index
    %3 = vector.load %arg6[%c0_3, %c0_4] : memref<1x64xf32, #tpu.memory_space<vmem>>, vector<1x64xf32>
    %4 = vector.broadcast %3 : vector<1x64xf32> to vector<16x64xf32>
    %5 = arith.addf %2, %4 : vector<16x64xf32>
    %6 = math.tanh %5 : vector<16x64xf32>
    %c0_5 = arith.constant 0 : index
    %c0_6 = arith.constant 0 : index
    %7 = vector.load %arg4[%c0_5, %c0_6] : memref<16x1xf32, #tpu.memory_space<vmem>>, vector<16x1xf32>
    %cst_7 = arith.constant 1.125000e-01 : f32
    %8 = vector.broadcast %cst_7 : f32 to vector<16x1xf32>
    %9 = arith.divf %8, %7 : vector<16x1xf32>
    %10 = vector.broadcast %9 : vector<16x1xf32> to vector<16x64xf32>
    %11 = arith.mulf %6, %10 : vector<16x64xf32>
    %c0_8 = arith.constant 0 : index
    %c0_9 = arith.constant 0 : index
    %12 = vector.load %arg2[%c0_8, %c0_9] : memref<16x16xf32, #tpu.memory_space<vmem>>, vector<16x16xf32>
    %c0_10 = arith.constant 0 : index
    %c0_11 = arith.constant 0 : index
    %13 = vector.load %arg7[%c0_10, %c0_11] : memref<16x8xf32, #tpu.memory_space<vmem>>, vector<16x8xf32>
    %cst_12 = arith.constant dense<0.000000e+00> : vector<16x8xf32>
    %14 = tpu.matmul %12, %13, %cst_12 {dimension_numbers = #tpu.dot_dimension_numbers<[1], [0], [0], [1], [0, 0, 1, 1], [], []>} : vector<16x16xf32>, vector<16x8xf32>, vector<16x8xf32> -> vector<16x8xf32>
    %c0_13 = arith.constant 0 : index
    %c0_14 = arith.constant 0 : index
    %15 = vector.load %arg8[%c0_13, %c0_14] : memref<1x8xf32, #tpu.memory_space<vmem>>, vector<1x8xf32>
    %16 = vector.broadcast %15 : vector<1x8xf32> to vector<16x8xf32>
    %17 = arith.addf %14, %16 : vector<16x8xf32>
    %18 = math.tanh %17 : vector<16x8xf32>
    %c0_15 = arith.constant 0 : index
    %c0_16 = arith.constant 0 : index
    %19 = vector.load %arg3[%c0_15, %c0_16] : memref<16x8xf32, #tpu.memory_space<vmem>>, vector<16x8xf32>
    %c0_17 = arith.constant 0 : index
    %c0_18 = arith.constant 0 : index
    %20 = vector.load %arg9[%c0_17, %c0_18] : memref<8x64xf32, #tpu.memory_space<vmem>>, vector<8x64xf32>
    %cst_19 = arith.constant dense<0.000000e+00> : vector<16x64xf32>
    %21 = tpu.matmul %19, %20, %cst_19 {dimension_numbers = #tpu.dot_dimension_numbers<[1], [0], [0], [1], [0, 0, 1, 1], [], []>} : vector<16x8xf32>, vector<8x64xf32>, vector<16x64xf32> -> vector<16x64xf32>
    %22 = arith.mulf %11, %21 : vector<16x64xf32>
    %c0_20 = arith.constant 0 : index
    %c0_21 = arith.constant 0 : index
    %23 = vector.load %arg10[%c0_20, %c0_21] : memref<64x8xf32, #tpu.memory_space<vmem>>, vector<64x8xf32>
    %cst_22 = arith.constant dense<0.000000e+00> : vector<16x8xf32>
    %24 = tpu.matmul %22, %23, %cst_22 {dimension_numbers = #tpu.dot_dimension_numbers<[1], [0], [0], [1], [0, 0, 1, 1], [], []>} : vector<16x64xf32>, vector<64x8xf32>, vector<16x8xf32> -> vector<16x8xf32>
    %25 = arith.addf %24, %18 : vector<16x8xf32>
    %c0_23 = arith.constant 0 : index
    %c0_24 = arith.constant 0 : index
    %26 = vector.load %arg11[%c0_23, %c0_24] : memref<16x8xf32, #tpu.memory_space<vmem>>, vector<16x8xf32>
    tpu.vector_store %arg11[%c0_23, %c0_24], %25 {strides = array<i32>} : memref<16x8xf32, #tpu.memory_space<vmem>>, vector<16x8xf32>,
    return
  }
  func.func @transform_0(%arg0: i32) -> (i32, i32) {
    %c0_i32 = arith.constant 0 : i32
    %c0_i32_0 = arith.constant 0 : i32
    return %arg0, %c0_i32 : i32, i32
  }
  func.func @transform_1(%arg0: i32) -> (i32, i32) {
    %c0_i32 = arith.constant 0 : i32
    %c0_i32_0 = arith.constant 0 : i32
    return %arg0, %c0_i32 : i32, i32
  }
  func.func @transform_2(%arg0: i32) -> (i32, i32) {
    %c0_i32 = arith.constant 0 : i32
    %c0_i32_0 = arith.constant 0 : i32
    return %arg0, %c0_i32 : i32, i32
  }
  func.func @transform_3(%arg0: i32) -> (i32, i32) {
    %c0_i32 = arith.constant 0 : i32
    %c0_i32_0 = arith.constant 0 : i32
    return %arg0, %c0_i32 : i32, i32
  }
  func.func @transform_4(%arg0: i32) -> (i32, i32) {
    %c0_i32 = arith.constant 0 : i32
    %c0_i32_0 = arith.constant 0 : i32
    %c0_i32_1 = arith.constant 0 : i32
    return %c0_i32, %c0_i32_0 : i32, i32
  }
  func.func @transform_5(%arg0: i32) -> (i32, i32) {
    %c0_i32 = arith.constant 0 : i32
    %c0_i32_0 = arith.constant 0 : i32
    %c0_i32_1 = arith.constant 0 : i32
    return %c0_i32, %c0_i32_0 : i32, i32
  }
  func.func @transform_6(%arg0: i32) -> (i32, i32) {
    %c0_i32 = arith.constant 0 : i32
    %c0_i32_0 = arith.constant 0 : i32
    %c0_i32_1 = arith.constant 0 : i32
    return %c0_i32, %c0_i32_0 : i32, i32
  }
  func.func @transform_7(%arg0: i32) -> (i32, i32) {
    %c0_i32 = arith.constant 0 : i32
    %c0_i32_0 = arith.constant 0 : i32
    %c0_i32_1 = arith.constant 0 : i32
    return %c0_i32, %c0_i32_0 : i32, i32
  }
  func.func @transform_8(%arg0: i32) -> (i32, i32) {
    %c0_i32 = arith.constant 0 : i32
    %c0_i32_0 = arith.constant 0 : i32
    %c0_i32_1 = arith.constant 0 : i32
    return %c0_i32, %c0_i32_0 : i32, i32
  }
  func.func @transform_9(%arg0: i32) -> (i32, i32) {
    %c0_i32 = arith.constant 0 : i32
    %c0_i32_0 = arith.constant 0 : i32
    %c0_i32_1 = arith.constant 0 : i32
    return %c0_i32, %c0_i32_0 : i32, i32
  }
  func.func @transform_10(%arg0: i32) -> (i32, i32) {
    %c0_i32 = arith.constant 0 : i32
    %c0_i32_0 = arith.constant 0 : i32
    return %arg0, %c0_i32 : i32, i32
  }
}

</mosaic_0001>

<bundles_post_ra>
// kernel: tpu_custom_call.1
= control target key start
LH: loop header
LB: loop body
LE: loop exit
PB: predicated region body
PF: predicated region fallthrough
CT: control target
= control target key end

     0   :  { %vm50_vm0 = vcmask 343040   ;;  %v565_v5 = vmov 0   ;;  %vm57_vm1 = vcmask 1041408   ;;  %vm254_vm2 = vcmask 64512   ;;  %s716_s4 = inlined_call_operand.vmem [shape: f32[42,64], index: 4, kind: input, shape index: {}]   ;;  %s717_s0 = inlined_call_operand.vmem [shape: f32[16,42], index: 0, kind: input, shape index: {}]   ;;  %s718_s8 = inlined_call_operand.vmem [shape: f32[8,64], index: 8, kind: input, shape index: {}]   ;;  %s719_s2 = inlined_call_operand.vmem [shape: f32[16,8], index: 2, kind: input, shape index: {}]   ;;  %s720_s3 = inlined_call_operand.vmem [shape: f32[16,1], index: 3, kind: input, shape index: {}]   ;;  %s721_s6 = inlined_call_operand.vmem [shape: f32[16,8], index: 6, kind: input, shape index: {}]   ;;  %s722_s9 = inlined_call_operand.vmem [shape: f32[64,8], index: 9, kind: input, shape index: {}]   ;;  %s723_s1 = inlined_call_operand.vmem [shape: f32[16,16], index: 1, kind: input, shape index: {}]   ;;  %s724_s5 = inlined_call_operand.vmem [shape: f32[1,64], index: 5, kind: input, shape index: {}]   ;;  %s725_s7 = inlined_call_operand.vmem [shape: f32[1,8], index: 7, kind: input, shape index: {}]   ;;  %s726_s10 = inlined_call_operand.vmem [shape: f32[16,8], index: 10, kind: output, shape index: {}]  }
   0x1   :  { %v37_v0 = vld [vmem:[%s716_s4] sm:$0xff]  ;;  %v38_v1 = vld [vmem:[%s716_s4 + $0x8] sm:$0xff]  ;;  %v39_v2 = vld [vmem:[%s716_s4 + $0x10] sm:$0xff]  ;;  %552 = vset.pattern.permute.xlu0 %v565_v5  ;;  %vm566_vm3 = vmmov 1   ;;  %vm167_vm5 = vcmask 130048   ;;  %vm346_vm6 = vcmask 523264  }
   0x2   :  { %v516_v3 = vpack.c.bf16 %v38_v1, %v37_v0  ;;  %v40_v4 = vld [vmem:[%s716_s4 + $0x18] sm:$0xff]  ;;  %v41_v7 = vld [vmem:[%s716_s4 + $0x20] sm:$0xff]  ;;  %v42_v8 = vld [vmem:[%s716_s4 + $0x28] sm:$0x3] }
   0x3   :  { %v520_v6 = vpack.c.bf16 %v40_v4, %v39_v2  ;;  %v35_v9 = vld [vmem:[%s717_s0] sm:$0xff]  ;;  %v252_v12 = vld [vmem:[%s719_s2 + $0x8] sm:$0xff]  ;;  %v524_v15 = vpack.c.bf16 %v42_v8, %v41_v7  ;;  %vm525_vm4 = vmpackc.low %vm57_vm1, %vm566_vm3 }
   0x4   :  { %517 = vmatprep.subr.bf16.mxu0 %v516_v3  ;;  %482 = vmatprep.mubr.msk.f32.mxu0 %vm50_vm0, %v35_v9  ;;  %v253_v10 = vld [vmem:[%s718_s8] sm:$0xff]  ;;  %v139_v14 = vld [vmem:[%s720_s3 + $0x8] sm:$0xff]  ;;  %v340_v29 = vld [vmem:[%s722_s9 + $0x10] sm:$0xff] }
   0x5   :  { %v251_v11 = vld [vmem:[%s719_s2] sm:$0xff]  ;;  %519 = vmatpush3.bf16.msra.mxu0 %v516_v3  ;;  %492 = vmatprep.subr.mxu1 %v253_v10  ;;  %v36_v16 = vld [vmem:[%s717_s0 + $0x8] sm:$0xff]  ;;  %v341_v30 = vld [vmem:[%s722_s9 + $0x18] sm:$0xff] }
   0x6   :  { %v138_v13 = vld [vmem:[%s720_s3] sm:$0xff]  ;;  %521 = vmatprep.subr.bf16.mxu0 %v520_v6  ;;  %493 = vmatpush3.msra.mxu1 %v253_v10  ;;  %v159_v22 = vld [vmem:[%s721_s6 + $0x8] sm:$0xff]  ;;  %v538_v31 = vpack.c.bf16 %v341_v30, %v340_v29  ;;  %v344_v35 = vld [vmem:[%s722_s9 + $0x30] sm:$0xff] }
   0x7   :  { %553 = vrcp.f32 %v138_v13  ;;  %494 = vmatprep.mubr.msk.f32.mxu1 %vm254_vm2, %v251_v11  ;;  %v158_v21 = vld [vmem:[%s721_s6] sm:$0xff]  ;;  %v339_v25 = vld [vmem:[%s722_s9 + $0x8] sm:$0xff]  ;;  %v345_v36 = vld [vmem:[%s722_s9 + $0x38] sm:$0xff] }
   0x8   :  { %555 = vrcp.f32 %v139_v14  ;;  %495 = vmatmul.mubr.msk.f32.vlgmr.msra.gmra.mrb[0].mxu1 %vm254_vm2, %v252_v12  ;;  %v530_v23 = vpack.c.bf16 %v159_v22, %v158_v21  ;;  %v338_v24 = vld [vmem:[%s722_s9] sm:$0xff]  ;;  %v157_v28 = vld [vmem:[%s723_s1 + $0x8] sm:$0xff]  ;;  %v546_v37 = vpack.c.bf16 %v345_v36, %v344_v35 }
   0x9   :  { %523 = vmatpush3.bf16.msra.mxu0 %v520_v6  ;;  %v534_v26 = vpack.c.bf16 %v339_v25, %v338_v24  ;;  %v156_v27 = vld [vmem:[%s723_s1] sm:$0xff]  ;;  %v343_v33 = vld [vmem:[%s722_s9 + $0x28] sm:$0xff] }
   0xa   :  { %526 = vmatprep.subr.msk.bf16.mxu0 %vm525_vm4, %v524_v15  ;;  %v342_v32 = vld [vmem:[%s722_s9 + $0x20] sm:$0xff] }
   0xb   :  { %535 = vmatprep.subr.bf16.mxu1 %v534_v26  ;;  %v542_v34 = vpack.c.bf16 %v343_v33, %v342_v32  ;;  %v434_v40 = vld [vmem:[%s724_s5] ss:$0 sm:$0xff] }
   0xc   :  { %537 = vmatpush3.bf16.msra.mxu1 %v534_v26  ;;  %v438_v55 = vld [vmem:[%s725_s7] ss:$0 sm:$0xff] }
   0xd   :  { %529 = vmatpush3.bf16.msk.msra.mxu0 %vm525_vm4, %v524_v15  ;;  %539 = vmatprep.subr.bf16.mxu1 %v538_v31 }
   0xe   :  { %531 = vmatprep.subr.bf16.mxu0 %v530_v23 }
  0x10   :  { %483 = vmatmul.mubr.msk.f32.vlgmr.msra.gmra.mrb[0].mxu0 %vm50_vm0, %v36_v16  ;;  %541 = vmatpush3.bf16.msra.mxu1 %v538_v31 }
  0x11   :  { %v554_v17 = vpop.eup %553  ;;  %533 = vmatpush3.bf16.msra.mxu0 %v530_v23  ;;  %489 = vmatprep.mubr.msk.f32.mxu0 %vm167_vm5, %v156_v27 }
  0x12   :  { %v556_v18 = vpop.eup %555  ;;  %v141_v19 = vmul.f32 0.1125, %v554_v17  ;;  %543 = vmatprep.subr.bf16.mxu1 %v542_v34 }
  0x13   :  { %v143_v20 = vmul.f32 0.1125, %v556_v18 }
  0x14   :  { %146 = vperm.xlu0 %552, %v141_v19   ;;  %490 = vmatmul.mubr.msk.f32.vlgmr.msra.gmra.mrb[2].mxu0 %vm167_vm5, %v157_v28 }
  0x15   :  { %545 = vmatpush3.bf16.msra.mxu1 %v542_v34 }
  0x16   :  { %547 = vmatprep.subr.bf16.mxu1 %v546_v37 }
  0x18   :  { %151 = vperm.xlu0 %552, %v143_v20  }
  0x19   :  { %549 = vmatpush3.bf16.msra.mxu1 %v546_v37 }
  0x93   :  { %v147_v45 = vpop.permute.xlu0 %146 }
  0x97   :  { %v152_v47 = vpop.permute.xlu0 %151 }
  0xdb   :  { %v496_v38 = vpop.f32.mrb[0].mxu1 }
  0xdc   :  { %v327_v39 = vpop.f32.mrb[1].mxu1 }
  0xe3   :  { %v484_v41 = vpop.f32.mrb[0].mxu0 }
  0xe4   :  { %v133_v42 = vadd.f32 %v484_v41, %v434_v40  ;;  %v127_v43 = vpop.f32.mrb[1].mxu0 }
  0xe5   :  { %v128_v44 = vadd.f32 %v434_v40, %v127_v43 }
  0xe6   :  { %557 = vtanh.f32 %v133_v42 }
  0xe7   :  { %559 = vtanh.f32 %v128_v44  ;;  %v491_v53 = vpop.f32.mrb[2].mxu0 }
  0xe8   :  { %v240_v54 = vpop.f32.mrb[3].mxu0  ;;  %v246_v56 = vadd.f32 %v491_v53, %v438_v55 }
  0xe9   :  { %v241_v57 = vadd.f32 %v438_v55, %v240_v54 }
  0xea   :  { %561 = vtanh.f32 %v246_v56 }
  0xeb   :  { %563 = vtanh.f32 %v241_v57 }
  0xf0   :  { %v558_v46 = vpop.eup %557 }
  0xf1   :  { %v560_v48 = vpop.eup %559  ;;  %v155_v49 = vmul.f32 %v558_v46, %v152_v47 }
  0xf2   :  { %v154_v50 = vmul.f32 %v560_v48, %v147_v45 }
  0xf3   :  { %v337_v51 = vmul.f32 %v496_v38, %v155_v49 }
  0xf4   :  { %v336_v52 = vmul.f32 %v327_v39, %v154_v50  ;;  %v562_v58 = vpop.eup %561 }
  0xf5   :  { %v564_v59 = vpop.eup %563 }
  0xf6   :  { %513 = vmatprep.mubr.msk.f32.mxu1 %vm346_vm6, %v336_v52 }
  0xf7   :  { %514 = vmatmul.mubr.msk.f32.vlgmr.msra.gmra.mrb[2].mxu1 %vm346_vm6, %v337_v51 }
 0x1ca   :  { %v515_v60 = vpop.f32.mrb[2].mxu1 }
 0x1cb   :  { %v425_v61 = vadd.f32 %v562_v58, %v515_v60  ;;  %v419_v62 = vpop.f32.mrb[3].mxu1 }
 0x1cc   :  { %v420_v63 = vadd.f32 %v564_v59, %v419_v62 }
 0x1cd   :  { %429 = vst.msk [vmem:[%s726_s10 + $0x8] sm:$0xff] %vm254_vm2, %v425_v61 }
 0x1ce   :  { %428 = vst.msk [vmem:[%s726_s10] sm:$0xff] %vm254_vm2, %v420_v63 }

</bundles_post_ra>
